<compile_context>
chip_gen: v7x
topology: tpu7x:2x2x1
jax: 0.10.0
libtpu: 0.0.40
codegen_flags: <defaults>
</compile_context>

<pallas_src>
import jax
import jax.numpy as jnp
from jax.experimental import pallas as pl
from jax.experimental.pallas import tpu as pltpu


def attention_kernel(facts_ref, mask_ref, w1_ref, b1_ref, w2_ref, out_ref):
    bt, n, d = facts_ref.shape
    x3 = facts_ref[...]                       # [Bt, N, D]
    x2 = x3.reshape(bt * n, d)                # layout-preserving when N % 8 == 0

    w1 = w1_ref[...]                          # [D, D]  (pre-transposed: y = x @ w1 + b1)
    b1 = b1_ref[...]                          # [1, D]
    w2 = w2_ref[...]                          # [1, D]  (Linear(D, 1) weight as a row)

    # scores = att(facts): Linear -> Tanh -> scoring head.
    h = jnp.tanh(jnp.dot(x2, w1, preferred_element_type=jnp.float32) + b1)   # [Bt*N, D]
    # Scoring head: VPU multiply + lane reduce over D -> dense [Bt, N] scores.
    s = jnp.sum((h * w2).reshape(bt, n, d), axis=-1)                          # [Bt, N]

    # softmax_with_mask over the facts axis N (lane axis -> cheap reductions).
    mask = mask_ref[...]                      # [Bt, N], 0/1 in f32
    s = jnp.where(mask > 0, s, jnp.float32(-1e30))
    m = jnp.max(s, axis=-1, keepdims=True)    # [Bt, 1]
    e = jnp.exp(s - m) * mask                 # [Bt, N]; mask mult zeroes fully-masked rows
    denom = jnp.sum(e, axis=-1, keepdims=True)
    # Guard fully-masked rows (incl. batch padding) against 0/0 -> NaN.
    p = e / jnp.maximum(denom, jnp.float32(1e-30))
    # TODO(synk): nn.Dropout(p=config.dropout) is eval-mode identity here.

    # Weighted sum over facts: [Bt, N, 1] * [Bt, N, D] reduced over N -> [Bt, D].
    out = jnp.sum(p[:, :, None] * x3.astype(jnp.float32), axis=1)
    out_ref[...] = out.astype(out_ref.dtype)


def attention_forward(facts, w1_t, b1, w2_t, fact_mask, *, block_b=None):
    """facts: [B,N,D], w1_t: [D,D] (= W1.T), b1: [D], w2_t: [D] (= W2.T of
    Linear(D,1,bias=False)), fact_mask: [B,N] (1=keep, 0=masked). Returns [B,D]."""
    B, N, D = facts.shape

    if block_b is None:
        # Target ~1024 matmul rows (Bt*N) per grid step to amortize per-step
        # overhead, but cap the facts tile at ~4 MiB so two input buffers +
        # output slab stay far below the default scoped-VMEM limit.
        rows_target = max(1, 1024 // max(N, 1))
        vmem_cap = max(1, (4 << 20) // max(N * D * 4, 1))
        block_b = max(1, min(rows_target, vmem_cap))
    block_b = min(block_b, B)
    if block_b < B:
        # Keep the (Bt, N) / (Bt, D) blocks sublane-aligned.
        block_b = max(8, (block_b // 8) * 8)
    num_blocks = pl.cdiv(B, block_b)
    b_pad = num_blocks * block_b

    mask_f = fact_mask.astype(jnp.float32)
    if b_pad != B:
        facts_p = jnp.pad(facts, ((0, b_pad - B), (0, 0), (0, 0)))
        mask_p = jnp.pad(mask_f, ((0, b_pad - B), (0, 0)))   # padded rows fully masked
    else:
        facts_p, mask_p = facts, mask_f

    b1_2d = b1.reshape(1, D)
    w2_2d = w2_t.reshape(1, D)

    out = pl.pallas_call(
        attention_kernel,
        out_shape=jax.ShapeDtypeStruct((b_pad, D), facts.dtype),
        grid_spec=pltpu.PrefetchScalarGridSpec(
            num_scalar_prefetch=0,
            grid=(num_blocks,),
            in_specs=[
                pl.BlockSpec((block_b, N, D), lambda i: (i, 0, 0)),   # facts tile
                pl.BlockSpec((block_b, N), lambda i: (i, 0)),         # mask tile
                pl.BlockSpec((D, D), lambda i: (0, 0)),               # W1^T (VMEM-resident)
                pl.BlockSpec((1, D), lambda i: (0, 0)),               # b1
                pl.BlockSpec((1, D), lambda i: (0, 0)),               # W2 row
            ],
            out_specs=pl.BlockSpec((block_b, D), lambda i: (i, 0)),   # dense [Bt, D] slab
        ),
        compiler_params=pltpu.CompilerParams(
            dimension_semantics=("parallel",)),
    )(facts_p, mask_p, w1_t, b1_2d, w2_2d)
    return out[:B]


def attention_ref(facts, w1_t, b1, w2_t, fact_mask):
    """Plain-JAX reference mirroring the PyTorch soft path."""
    h = jnp.tanh(facts @ w1_t + b1)                        # [B, N, D]
    s = h @ w2_t.reshape(-1, 1)                            # [B, N, 1]
    keep = (fact_mask[..., None] > 0)
    s = jnp.where(keep, s, -1e30)
    m = jnp.max(s, axis=1, keepdims=True)
    e = jnp.exp(s - m) * keep.astype(jnp.float32)
    p = e / jnp.sum(e, axis=1, keepdims=True)              # [B, N, 1]
    return jnp.sum(p * facts, axis=1)                      # [B, D]


if __name__ == "__main__":
    key = jax.random.PRNGKey(0)
    k_facts, k_w1, k_b1, k_w2, k_facts2 = jax.random.split(key, 5)

    N, D = 8, 32   # num facts, input_dim

    # Deterministic "nn.Linear"-shaped parameters.
    bound1 = 1.0 / (D ** 0.5)
    W1 = jax.random.uniform(k_w1, (D, D), jnp.float32, -bound1, bound1)   # [out, in]
    b1 = jax.random.uniform(k_b1, (D,), jnp.float32, -bound1, bound1)
    W2 = jax.random.uniform(k_w2, (1, D), jnp.float32, -bound1, bound1)   # Linear(D,1,bias=False)
    w1_t = W1.T           # [D, D] so that y = x @ w1_t + b1
    w2_t = W2.reshape(D)  # [D]

    # Case 1: tiny batch (single grid step, blocks == full dims).
    B = 2
    facts = jax.random.normal(k_facts, (B, N, D), dtype=jnp.float32)
    fact_mask = jnp.array([[1] * N, [1] * (N - 3) + [0] * 3], dtype=jnp.float32)

    out = jax.block_until_ready(attention_forward(facts, w1_t, b1, w2_t, fact_mask))
    ref = attention_ref(facts, w1_t, b1, w2_t, fact_mask)
    assert out.shape == (B, D)
    assert bool(jnp.all(jnp.isfinite(out)))
    assert bool(jnp.allclose(out, ref, atol=1e-4, rtol=1e-4)), (
        f"case1 max abs err {jnp.max(jnp.abs(out - ref))}")

    # Case 2: exercises the batch-tiled grid + padding path (B=20, Bt=8 -> 3 steps).
    B2 = 20
    facts2 = jax.random.normal(k_facts2, (B2, N, D), dtype=jnp.float32)
    fact_mask2 = (jnp.arange(N)[None, :] < (jnp.arange(B2)[:, None] % N) + 1
                  ).astype(jnp.float32)

    out2 = jax.block_until_ready(
        attention_forward(facts2, w1_t, b1, w2_t, fact_mask2, block_b=8))
    ref2 = attention_ref(facts2, w1_t, b1, w2_t, fact_mask2)
    assert out2.shape == (B2, D)
    assert bool(jnp.all(jnp.isfinite(out2)))
    assert bool(jnp.allclose(out2, ref2, atol=1e-4, rtol=1e-4)), (
        f"case2 max abs err {jnp.max(jnp.abs(out2 - ref2))}")

    print("KERNEL_OK")
</pallas_src>

<mosaic_0001>
module attributes {stable_mosaic.version = 11 : i64} {
  func.func @attention_kernel(%arg0: i32, %arg1: memref<2x8x32xf32, #tpu.memory_space<vmem>>, %arg2: memref<2x8xf32, #tpu.memory_space<vmem>>, %arg3: memref<32x32xf32, #tpu.memory_space<vmem>>, %arg4: memref<1x32xf32, #tpu.memory_space<vmem>>, %arg5: memref<1x32xf32, #tpu.memory_space<vmem>>, %arg6: memref<2x32xf32, #tpu.memory_space<vmem>>) attributes {dimension_semantics = [#tpu.dimension_semantics<parallel>], iteration_bounds = array<i64: 1>, scalar_prefetch = 0 : i64, scratch_operands = 0 : i64, tpu.core_type = #tpu.core_type<tc>, window_params = [{transform_indices = @transform_0, window_bounds = array<i64: 2, 8, 32>}, {transform_indices = @transform_1, window_bounds = array<i64: 2, 8>}, {pipeline_mode = #tpu.pipeline_mode<synchronous>, transform_indices = @transform_2, window_bounds = array<i64: 32, 32>}, {pipeline_mode = #tpu.pipeline_mode<synchronous>, transform_indices = @transform_3, window_bounds = array<i64: 1, 32>}, {pipeline_mode = #tpu.pipeline_mode<synchronous>, transform_indices = @transform_4, window_bounds = array<i64: 1, 32>}, {transform_indices = @transform_5, window_bounds = array<i64: 2, 32>}]} {
    %c0 = arith.constant 0 : index
    %c0_0 = arith.constant 0 : index
    %c0_1 = arith.constant 0 : index
    %0 = vector.load %arg1[%c0, %c0_0, %c0_1] : memref<2x8x32xf32, #tpu.memory_space<vmem>>, vector<2x8x32xf32>
    %1 = vector.shape_cast %0 : vector<2x8x32xf32> to vector<16x32xf32>
    %c0_2 = arith.constant 0 : index
    %c0_3 = arith.constant 0 : index
    %2 = vector.load %arg3[%c0_2, %c0_3] : memref<32x32xf32, #tpu.memory_space<vmem>>, vector<32x32xf32>
    %c0_4 = arith.constant 0 : index
    %c0_5 = arith.constant 0 : index
    %3 = vector.load %arg4[%c0_4, %c0_5] : memref<1x32xf32, #tpu.memory_space<vmem>>, vector<1x32xf32>
    %c0_6 = arith.constant 0 : index
    %c0_7 = arith.constant 0 : index
    %4 = vector.load %arg5[%c0_6, %c0_7] : memref<1x32xf32, #tpu.memory_space<vmem>>, vector<1x32xf32>
    %cst = arith.constant dense<0.000000e+00> : vector<16x32xf32>
    %5 = tpu.matmul %1, %2, %cst {dimension_numbers = #tpu.dot_dimension_numbers<[1], [0], [0], [1], [0, 0, 1, 1], [], []>} : vector<16x32xf32>, vector<32x32xf32>, vector<16x32xf32> -> vector<16x32xf32>
    %6 = vector.broadcast %3 : vector<1x32xf32> to vector<16x32xf32>
    %7 = arith.addf %5, %6 : vector<16x32xf32>
    %8 = math.tanh %7 : vector<16x32xf32>
    %9 = vector.broadcast %4 : vector<1x32xf32> to vector<16x32xf32>
    %10 = arith.mulf %8, %9 : vector<16x32xf32>
    %11 = vector.shape_cast %10 : vector<16x32xf32> to vector<2x8x32xf32>
    %cst_8 = arith.constant dense<0.000000e+00> : vector<2x8xf32>
    %12 = vector.multi_reduction <add>, %11, %cst_8 [2] : vector<2x8x32xf32> to vector<2x8xf32>
    %c0_9 = arith.constant 0 : index
    %c0_10 = arith.constant 0 : index
    %13 = vector.load %arg2[%c0_9, %c0_10] : memref<2x8xf32, #tpu.memory_space<vmem>>, vector<2x8xf32>
    %cst_11 = arith.constant 0.000000e+00 : f32
    %14 = vector.broadcast %cst_11 : f32 to vector<2x8xf32>
    %15 = arith.cmpf ogt, %13, %14 : vector<2x8xf32>
    %cst_12 = arith.constant -1.000000e+30 : f32
    %16 = vector.broadcast %cst_12 : f32 to vector<2x8xf32>
    %17 = arith.select %15, %12, %16 : vector<2x8xi1>, vector<2x8xf32>
    %cst_13 = arith.constant dense<0xFF800000> : vector<2xf32>
    %18 = vector.multi_reduction <maximumf>, %17, %cst_13 [1] : vector<2x8xf32> to vector<2xf32>
    %19 = vector.shape_cast %18 : vector<2xf32> to vector<2x1xf32>
    %20 = vector.broadcast %19 : vector<2x1xf32> to vector<2x8xf32>
    %21 = arith.subf %17, %20 : vector<2x8xf32>
    %22 = math.exp %21 : vector<2x8xf32>
    %23 = arith.mulf %22, %13 : vector<2x8xf32>
    %cst_14 = arith.constant dense<0.000000e+00> : vector<2xf32>
    %24 = vector.multi_reduction <add>, %23, %cst_14 [1] : vector<2x8xf32> to vector<2xf32>
    %25 = vector.shape_cast %24 : vector<2xf32> to vector<2x1xf32>
    %cst_15 = arith.constant 1.000000e-30 : f32
    %26 = vector.broadcast %cst_15 : f32 to vector<2x1xf32>
    %27 = arith.maximumf %25, %26 : vector<2x1xf32>
    %28 = vector.broadcast %27 : vector<2x1xf32> to vector<2x8xf32>
    %29 = arith.divf %23, %28 : vector<2x8xf32>
    %30 = vector.shape_cast %29 : vector<2x8xf32> to vector<2x8x1xf32>
    %31 = vector.broadcast %30 : vector<2x8x1xf32> to vector<2x8x32xf32>
    %32 = arith.mulf %31, %0 : vector<2x8x32xf32>
    %cst_16 = arith.constant dense<0.000000e+00> : vector<2x32xf32>
    %33 = vector.multi_reduction <add>, %32, %cst_16 [1] : vector<2x8x32xf32> to vector<2x32xf32>
    %c0_17 = arith.constant 0 : index
    %c0_18 = arith.constant 0 : index
    %34 = vector.load %arg6[%c0_17, %c0_18] : memref<2x32xf32, #tpu.memory_space<vmem>>, vector<2x32xf32>
    tpu.vector_store %arg6[%c0_17, %c0_18], %33 {strides = array<i32>} : memref<2x32xf32, #tpu.memory_space<vmem>>, vector<2x32xf32>,
    return
  }
  func.func @transform_0(%arg0: i32) -> (i32, i32, i32) {
    %c0_i32 = arith.constant 0 : i32
    %c0_i32_0 = arith.constant 0 : i32
    %c0_i32_1 = arith.constant 0 : i32
    return %arg0, %c0_i32, %c0_i32_0 : i32, i32, i32
  }
  func.func @transform_1(%arg0: i32) -> (i32, i32) {
    %c0_i32 = arith.constant 0 : i32
    %c0_i32_0 = arith.constant 0 : i32
    return %arg0, %c0_i32 : i32, i32
  }
  func.func @transform_2(%arg0: i32) -> (i32, i32) {
    %c0_i32 = arith.constant 0 : i32
    %c0_i32_0 = arith.constant 0 : i32
    %c0_i32_1 = arith.constant 0 : i32
    return %c0_i32, %c0_i32_0 : i32, i32
  }
  func.func @transform_3(%arg0: i32) -> (i32, i32) {
    %c0_i32 = arith.constant 0 : i32
    %c0_i32_0 = arith.constant 0 : i32
    %c0_i32_1 = arith.constant 0 : i32
    return %c0_i32, %c0_i32_0 : i32, i32
  }
  func.func @transform_4(%arg0: i32) -> (i32, i32) {
    %c0_i32 = arith.constant 0 : i32
    %c0_i32_0 = arith.constant 0 : i32
    %c0_i32_1 = arith.constant 0 : i32
    return %c0_i32, %c0_i32_0 : i32, i32
  }
  func.func @transform_5(%arg0: i32) -> (i32, i32) {
    %c0_i32 = arith.constant 0 : i32
    %c0_i32_0 = arith.constant 0 : i32
    return %arg0, %c0_i32 : i32, i32
  }
}

</mosaic_0001>

<bundles_post_ra>
// kernel: tpu_custom_call.1
= control target key start
LH: loop header
LB: loop body
LE: loop exit
PB: predicated region body
PF: predicated region fallthrough
CT: control target
= control target key end

     0   :  { %10 = vsyncpa [#allocation3], 0  ;;  %s451_s0 = inlined_call_operand.hbm [shape: f32[2,8,32], index: 0, kind: input, shape index: {}]   ;;  %s452_s1 = inlined_call_operand.vmem [shape: f32[2,8], index: 1, kind: input, shape index: {}]   ;;  %s453_s2 = inlined_call_operand.hbm [shape: f32[32,32], index: 2, kind: input, shape index: {}]   ;;  %s454_s3 = inlined_call_operand.vmem [shape: f32[1,32], index: 3, kind: input, shape index: {}]   ;;  %s455_s4 = inlined_call_operand.vmem [shape: f32[1,32], index: 4, kind: input, shape index: {}]   ;;  %s456_s5 = inlined_call_operand.hbm [shape: f32[2,32], index: 5, kind: output, shape index: {}]  }
   0x1   :  { %11 = vsyncpa [#allocation6], 0 }
   0x2   :  { %12 = vsyncpa [#allocation4], 0  ;;  %s359_s18 = smov [#allocation2]   ;;  %s287_s22 = scalar_lea.hbm %s451_s0, 256 }
   0x3   :  { %s18_s19 = sshll.u32 %s359_s18, 4  ;;  %p288_p0 = scmp.ne.s32.totalorder %s451_s0, %s287_s22  ;;  %s19_s19 = int_to_ptr.vmem [resolvable:$true] %s18_s19 }
   0x4   :  { %p291_p1 = scmp.lt.u32.totalorder %s287_s22, %s451_s0 }
   0x6   :  { %p293_p2 = pnand %p291_p1, %p288_p0 }
   0x8   :  { %296 = shalt.err (!%p293_p2)
}
   0x9   :  { %s297_s27 = scalar_lea.vmem %s19_s19, 256  ;;  %p302_p4 = scmp.lt.s32.totalorder %s19_s19, %s19_s19 }
   0xa   :  { %p298_p3 = scmp.ne.s32.totalorder %s19_s19, %s297_s27  ;;  %p303_p5 = scmp.lt.s32.totalorder %s297_s27, %s297_s27 }
   0xc   :  { %p304_p6 = por %p303_p5, %p302_p4 }
   0xe   :  { %p305_p7 = pnand %p304_p6, %p298_p3 }
  0x10   :  { %308 = shalt.err (!%p305_p7)
}
  0x11   :  { %s360_s28 = smov 128   ;;  %s361_s29 = smov 8  }
  0x12   :  { %24 = dma.hbm_to_vmem [thread:$0]  %s451_s0, 256, %s19_s19, [#allocation3], %s360_s28, %s360_s28, %s361_s29  }
  0x13   :  { %s362_s7 = smov [#allocation5]   ;;  %s309_s11 = scalar_lea.hbm %s453_s2, 512 }
  0x14   :  { %s32_s8 = sshll.u32 %s362_s7, 4  ;;  %p310_p8 = scmp.ne.s32.totalorder %s453_s2, %s309_s11  ;;  %s33_s8 = int_to_ptr.vmem [resolvable:$true] %s32_s8 }
  0x15   :  { %p313_p9 = scmp.lt.u32.totalorder %s309_s11, %s453_s2 }
  0x17   :  { %p315_p10 = pnand %p313_p9, %p310_p8 }
  0x19   :  { %318 = shalt.err (!%p315_p10)
}
  0x1a   :  { %s319_s16 = scalar_lea.vmem %s33_s8, 512  ;;  %p324_p12 = scmp.lt.s32.totalorder %s33_s8, %s33_s8 }
  0x1b   :  { %p320_p11 = scmp.ne.s32.totalorder %s33_s8, %s319_s16  ;;  %p325_p13 = scmp.lt.s32.totalorder %s319_s16, %s319_s16 }
  0x1d   :  { %p326_p0 = por %p325_p13, %p324_p12 }
  0x1f   :  { %p327_p1 = pnand %p326_p0, %p320_p11 }
  0x21   :  { %330 = shalt.err (!%p327_p1)
}
  0x22   :  { %38 = dma.hbm_to_vmem [thread:$0]  %s453_s2, 512, %s33_s8, [#allocation6], %s360_s28, %s360_s28, %s361_s29  }
  0x23   :  { %353 = dma.done.wait [#allocation3], 256  }
  0x24   :  { %354 = vsyncadd [#allocation3], 4294967040 }
  0x25   :  { %355 = dma.done.wait [#allocation6], 512  }
  0x26   :  { %356 = vsyncadd [#allocation6], 4294966784  ;;  %vm63_vm0 = vcmask 261120   ;;  %v51_v0 = vld [vmem:[#allocation5] sm:$0xff]  ;;  %v52_v1 = vld [vmem:[#allocation5 + $0x8] sm:$0xff]  ;;  %v165_v20 = vlaneseq  ;;  %vm175_vm1 = vcmask 1041409  }
  0x27   :  { %v53_v2 = vld [vmem:[#allocation5 + $0x10] sm:$0xff]  ;;  %v266_v3 = vpack.c.bf16 %v52_v1, %v51_v0  ;;  %v54_v4 = vld [vmem:[#allocation5 + $0x18] sm:$0xff]  ;;  %vm179_vm3 = vcmask 58368   ;;  %vm227_vm4 = vcmask 254976  }
  0x28   :  { %v418_v5 = vld [vmem:[#allocation2] sm:$0xff]  ;;  %v270_v6 = vpack.c.bf16 %v54_v4, %v53_v2  ;;  %v50_v7 = vld [vmem:[#allocation2 + $0x8] sm:$0xff]  ;;  %v166_v21 = vand.u32 127, %v165_v20  ;;  %v168_v22 = vshrl.u32 %v165_v20, 7 }
  0x29   :  { %263 = vmatprep.mubr.msk.f32.mxu0 %vm63_vm0, %v418_v5  ;;  %267 = vmatprep.subr.bf16.mxu0 %v266_v3  ;;  %v245_v8 = vld [vmem:[%s454_s3] ss:$0 sm:$0xff] }
  0x2a   :  { %269 = vmatpush3.bf16.msra.mxu0 %v266_v3  ;;  %v248_v13 = vld [vmem:[%s455_s4] ss:$0 sm:$0xff]  ;;  %v169_v24 = vsub.s32 %v166_v21, %v168_v22  ;;  %v202_v40 = vsub.s32 1, %v168_v22  ;;  %v195_v41 = vsub.s32 0, %v168_v22 }
  0x2b   :  { %271 = vmatprep.subr.bf16.mxu0 %v270_v6  ;;  %v161_v25 = vld [vmem:[%s452_s1] sm:$0x3]  ;;  %s363_s1 = smov [#allocation7]  }
  0x2c   :  { %vm162_vm2 = vcmp.gt.f32.partialorder %v161_v25, 0.0  ;;  %s235_s4 = sshll.u32 %s363_s1, 4  ;;  %s236_s4 = int_to_ptr.vmem [resolvable:$true] %s235_s4 }
  0x2d   :  { %s331_s22 = scalar_lea.vmem %s236_s4, 32  ;;  %p336_p3 = scmp.lt.s32.totalorder %s236_s4, %s236_s4 }
  0x2e   :  { %273 = vmatpush3.bf16.msra.mxu0 %v270_v6  ;;  %p332_p2 = scmp.ne.s32.totalorder %s236_s4, %s331_s22  ;;  %p337_p4 = scmp.lt.s32.totalorder %s331_s22, %s331_s22 }
  0x30   :  { %p338_p5 = por %p337_p4, %p336_p3 }
  0x31   :  { %264 = vmatmul.mubr.msk.f32.vlgmr.msra.gmra.mrb[0].mxu0 %vm63_vm0, %v50_v7 }
  0x32   :  { %p339_p6 = pnand %p338_p5, %p332_p2 }
 0x104   :  { %v265_v9 = vpop.f32.mrb[0].mxu0 }
 0x105   :  { %v142_v10 = vadd.f32 %v265_v9, %v245_v8  ;;  %v136_v11 = vpop.f32.mrb[1].mxu0 }
 0x106   :  { %v137_v12 = vadd.f32 %v245_v8, %v136_v11 }
 0x107   :  { %279 = vtanh.f32 %v142_v10 }
 0x108   :  { %281 = vtanh.f32 %v137_v12 }
 0x111   :  { %v280_v14 = vpop.eup %279 }
 0x112   :  { %v282_v15 = vpop.eup %281  ;;  %v154_v18 = vmul.f32 %v280_v14, %v248_v13 }
 0x113   :  { %v153_v16 = vmul.f32 %v282_v15, %v248_v13 }
 0x114   :  { %v158_v19 = vsel %vm63_vm0, %v154_v18, 0.0 }
 0x115   :  { %v155_v17 = vsel %vm63_vm0, %v153_v16, 0.0 }
 0x116   :  { %156 = vadd.xlane.f32.xlu0 %v155_v17 }
 0x11a   :  { %159 = vadd.xlane.f32.xlu0 %v158_v19 }
 0x1a3   :  { %v157_v23 = vpop.xlane.xlu0 %156 }
 0x1a4   :  { %v170_v27 = vrot.slane %v157_v23, %v169_v24 }
 0x1a7   :  { %v160_v26 = vpop.xlane.xlu0 %159 }
 0x1a8   :  { %v174_v28 = vrot.slane %v160_v26, %v169_v24 }
 0x1aa   :  { %v176_v29 = vsel %vm175_vm1, %v174_v28, %v170_v27 }
 0x1ab   :  { %v178_v30 = vsel %vm162_vm2, %v176_v29, -1e+30 }
 0x1ac   :  { %v180_v31 = vsel %vm179_vm3, %v178_v30, -inf }
 0x1ad   :  { %181 = vmax.xlane.f32.xlu1 %v180_v31 }
 0x23a   :  { %v182_v32 = vpop.xlane.xlu1 %181 }
 0x23b   :  { %v183_v33 = vsub.f32 %v178_v30, %v182_v32 }
 0x23d   :  { %v184_v34 = vmul.f32 1.442695, %v183_v33 }
 0x23f   :  { %283 = vpow2.f32 %v184_v34 }
 0x249   :  { %v284_v35 = vpop.eup %283 }
 0x24a   :  { %v186_v36 = vmul.f32 %v284_v35, %v161_v25 }
 0x24c   :  { %v187_v37 = vsel %vm179_vm3, %v186_v36, 0.0 }
 0x24d   :  { %188 = vadd.xlane.f32.xlu1 %v187_v37 }
 0x2da   :  { %v189_v38 = vpop.xlane.xlu1 %188 }
 0x2db   :  { %v190_v39 = vmax.f32 %v189_v38, 1e-30 }
 0x2dd   :  { %285 = vrcp.f32 %v190_v39 }
 0x2e7   :  { %v286_v42 = vpop.eup %285 }
 0x2e8   :  { %v192_v43 = vmul.f32 %v286_v42, %v186_v36 }
 0x2ea   :  { %v203_v44 = vrot.slane %v192_v43, %v202_v40  ;;  %v196_v45 = vrot.slane %v192_v43, %v195_v41 }
 0x2ec   :  { %205 = vbcast.lane.b32.xlu1 %v203_v44, 256  ;;  %198 = vbcast.lane.b32.xlu0 %v196_v45, 256 }
 0x35e   :  { %v206_v46 = vpop.permute.xlu1 %205  ;;  %v199_v47 = vpop.permute.xlu0 %198 }
 0x35f   :  { %v208_v48 = vmul.f32 %v206_v46, %v50_v7  ;;  %v207_v49 = vmul.f32 %v199_v47, %v418_v5 }
 0x361   :  { %v216_v50 = vsel %vm63_vm0, %v208_v48, 0.0  ;;  %v209_v51 = vsel %vm63_vm0, %v207_v49, 0.0 }
 0x362   :  { %v217_v52 = vrot.slane %v216_v50, 4  ;;  %v210_v53 = vrot.slane %v209_v51, 4 }
 0x364   :  { %v218_v54 = vadd.f32 %v217_v52, %v216_v50  ;;  %v211_v55 = vadd.f32 %v210_v53, %v209_v51 }
 0x366   :  { %v219_v56 = vrot.slane %v218_v54, 2  ;;  %v212_v57 = vrot.slane %v211_v55, 2 }
 0x368   :  { %v220_v58 = vadd.f32 %v219_v56, %v218_v54  ;;  %v213_v59 = vadd.f32 %v212_v57, %v211_v55 }
 0x36a   :  { %v221_v60 = vrot.slane %v220_v58, 1  ;;  %v214_v61 = vrot.slane %v213_v59, 1 }
 0x36c   :  { %v222_v62 = vadd.f32 %v221_v60, %v220_v58  ;;  %v215_v63 = vadd.f32 %v214_v61, %v213_v59 }
 0x36e   :  { %v225_v0 = vsel %vm175_vm1, %v222_v62, %v215_v63 }
 0x36f   :  { %228 = vst.msk [vmem:[#allocation7] sm:$0x3] %vm227_vm4, %v225_v0 }
 0x370   :  { %342 = shalt.err (!%p339_p6)
}
 0x371   :  { %s343_s25 = scalar_lea.hbm %s456_s5, 32 }
 0x372   :  { %p344_p7 = scmp.ne.s32.totalorder %s456_s5, %s343_s25  ;;  %p347_p8 = scmp.lt.u32.totalorder %s343_s25, %s456_s5 }
 0x374   :  { %p349_p9 = pnand %p347_p8, %p344_p7 }
 0x376   :  { %352 = shalt.err (!%p349_p9)
}
 0x377   :  { %238 = dma.vmem_to_hbm [thread:$0]  %s236_s4, 32, %s456_s5, [#allocation4]  }
 0x378   :  { %357 = dma.done.wait [#allocation4], 32  }
 0x379   :  { %358 = vsyncadd [#allocation4], 4294967264 }
 0x37a   :  { %242 = vsyncpa [#allocation3], 1 }
 0x37b   :  { %243 = vsyncpa [#allocation6], 1 }
 0x37c   :  { %244 = vsyncpa [#allocation4], 1 }

</bundles_post_ra>
